<compile_context>
chip_gen: v7x
topology: tpu7x:2x2x1
jax: 0.10.0
libtpu: 0.0.40
codegen_flags: <defaults>
</compile_context>

<pallas_src>
import functools

import jax
import jax.numpy as jnp
from jax.experimental import pallas as pl
from jax.experimental.pallas import tpu as pltpu


# ----------------------------------------------------------------------------
# Kernels
# ----------------------------------------------------------------------------
def _add_pos_tile_kernel(x_ref, pos_ref, o_ref):
    # Path B body: x_ref / pos_ref / o_ref are (ts, D) -- pure same-shape add.
    o_ref[...] = (x_ref[...] + pos_ref[...]).astype(o_ref.dtype)


def _add_pos_batchfold_kernel(seq_len, x_ref, pos_ref, o_ref):
    # Path A body: x_ref / o_ref are (bt, S, D); pos_ref is (S_pad, D).
    # Static slice [:seq_len] is a zero-cost view; broadcast add is pure VPU.
    pos = pos_ref[0:seq_len, :]
    o_ref[...] = (x_ref[...] + pos[None, :, :]).astype(o_ref.dtype)


# ----------------------------------------------------------------------------
# Tiling helpers
# ----------------------------------------------------------------------------
def _round_up(n: int, m: int) -> int:
    return ((n + m - 1) // m) * m


def _sublane(itemsize: int) -> int:
    # Sublane packing: f32 -> 8 rows, bf16 -> 16, int8/fp8 -> 32.
    return max(8, 32 // max(1, itemsize))


def _pick_seq_tile(S: int, D: int, itemsize: int, target_block_bytes: int) -> int:
    """Largest sublane-aligned seq tile with <= target_block_bytes."""
    sub = _sublane(itemsize)
    max_rows = max(1, target_block_bytes // max(1, D * itemsize))
    if S <= max_rows:
        return S  # full extent along seq -- always a legal block shape
    ts = (max_rows // sub) * sub
    return max(sub, ts)


# ----------------------------------------------------------------------------
# Wrapper
# ----------------------------------------------------------------------------
def absolute_positional_embedding(
    x: jax.Array,
    pos_table: jax.Array,
    *,
    target_block_bytes: int = 4 * 1024 * 1024,
    donate_input: bool = False,
) -> jax.Array:
    """x: (B, S, D); pos_table: (max_seq, D). Returns x + pos_table[:S]."""
    B, S, D = x.shape
    max_seq = pos_table.shape[0]
    assert max_seq >= S, "sequence longer than positional table"
    assert pos_table.shape[1] == D

    # Cast the (small) positional table up front: halves its DMA bytes when
    # x is bf16 and avoids per-block upcast/downcast on the VALU.
    if pos_table.dtype != x.dtype:
        pos_table = pos_table.astype(x.dtype)

    itemsize = jnp.dtype(x.dtype).itemsize
    per_batch_bytes = S * D * itemsize
    aliases = {0: 0} if donate_input else {}
    # 32 MiB: equals the v6e/v7x scoped default, lifts v5e's 16 MiB default so
    # the ~4 MiB double-buffered blocks keep their roofline-saturating size.
    vmem_limit = 32 << 20

    if per_batch_bytes <= target_block_bytes:
        # ------------------------------------------------------------------
        # Path A: batch-fold.  Whole (S, D) slab per batch fits the budget.
        # ------------------------------------------------------------------
        bt = max(1, min(B, target_block_bytes // max(1, per_batch_bytes)))
        sub = _sublane(itemsize)
        s_pad = min(max_seq, _round_up(S, sub))  # legal pos block height

        kernel = functools.partial(_add_pos_batchfold_kernel, S)
        return pl.pallas_call(
            kernel,
            out_shape=jax.ShapeDtypeStruct((B, S, D), x.dtype),
            grid_spec=pltpu.PrefetchScalarGridSpec(
                num_scalar_prefetch=0,
                grid=(pl.cdiv(B, bt),),
                in_specs=[
                    # x: bt batches per step, full (S, D) slab (lane-dense).
                    pl.BlockSpec((bt, S, D), lambda i: (i, 0, 0)),
                    # pos: constant block index -> fetched once, reused.
                    pl.BlockSpec((s_pad, D), lambda i: (0, 0)),
                ],
                out_specs=pl.BlockSpec((bt, S, D), lambda i: (i, 0, 0)),
            ),
            compiler_params=pltpu.CompilerParams(
                dimension_semantics=("parallel",),
                vmem_limit_bytes=vmem_limit,
            ),
            input_output_aliases=aliases,
        )(x, pos_table)

    # ----------------------------------------------------------------------
    # Path B: seq-tiled, batch INNERMOST so the pos tile is reused per batch.
    # ----------------------------------------------------------------------
    ts = _pick_seq_tile(S, D, itemsize, target_block_bytes)
    grid = (pl.cdiv(S, ts), B)

    return pl.pallas_call(
        _add_pos_tile_kernel,
        out_shape=jax.ShapeDtypeStruct((B, S, D), x.dtype),
        grid_spec=pltpu.PrefetchScalarGridSpec(
            num_scalar_prefetch=0,
            grid=grid,
            in_specs=[
                # x: batch dim squeezed, seq tiled, full D (lane-dense).
                pl.BlockSpec((None, ts, D), lambda s, b: (b, s, 0)),
                # pos: block index independent of b -> no re-DMA per batch.
                pl.BlockSpec((ts, D), lambda s, b: (s, 0)),
            ],
            out_specs=pl.BlockSpec((None, ts, D), lambda s, b: (b, s, 0)),
        ),
        compiler_params=pltpu.CompilerParams(
            # Seq axis parallel keeps both v7x TensorCores busy even at B=1;
            # batch stays innermost/"arbitrary" to preserve pos-tile reuse.
            dimension_semantics=("parallel", "arbitrary"),
            vmem_limit_bytes=vmem_limit,
        ),
        input_output_aliases=aliases,
    )(x, pos_table)


if __name__ == "__main__":
    # Module hyperparameters (small, but lane-dense embed dim).
    max_seq_length = 16
    embed_dim = 128

    # Small example shapes consistent with the forward: x is (batch, seq, D).
    batch, seq = 2, 8

    key = jax.random.PRNGKey(0)
    k_x, k_emb = jax.random.split(key)

    x = jax.random.normal(k_x, (batch, seq, embed_dim), dtype=jnp.float32)
    # Deterministic stand-in for nn.Embedding(max_seq_length, embed_dim).weight
    pos_table = jax.random.normal(
        k_emb, (max_seq_length, embed_dim), dtype=jnp.float32
    )

    ref = x + pos_table[:seq][None, :, :]

    # Default path (batch-fold for this small shape).
    out = absolute_positional_embedding(x, pos_table)
    out = jax.block_until_ready(out)
    assert out.shape == x.shape and out.dtype == x.dtype
    assert jnp.allclose(out, ref, atol=1e-6), "mismatch vs reference (Path A)"

    # Also exercise the seq-tiled / batch-innermost path by shrinking the
    # block budget (forces Path B at these small shapes).
    out_b = absolute_positional_embedding(x, pos_table, target_block_bytes=2048)
    out_b = jax.block_until_ready(out_b)
    assert jnp.allclose(out_b, ref, atol=1e-6), "mismatch vs reference (Path B)"

    print("KERNEL_OK")
</pallas_src>

<mosaic_0001>
module attributes {stable_mosaic.version = 11 : i64} {
  func.func @_add_pos_batchfold_kernel(%arg0: i32, %arg1: memref<2x8x128xf32, #tpu.memory_space<vmem>>, %arg2: memref<8x128xf32, #tpu.memory_space<vmem>>, %arg3: memref<2x8x128xf32, #tpu.memory_space<vmem>>) attributes {dimension_semantics = [#tpu.dimension_semantics<parallel>], iteration_bounds = array<i64: 1>, scalar_prefetch = 0 : i64, scratch_operands = 0 : i64, tpu.core_type = #tpu.core_type<tc>, window_params = [{transform_indices = @transform_0, window_bounds = array<i64: 2, 8, 128>}, {transform_indices = @transform_1, window_bounds = array<i64: 8, 128>}, {transform_indices = @transform_2, window_bounds = array<i64: 2, 8, 128>}]} {
    %c0 = arith.constant 0 : index
    %c0_0 = arith.constant 0 : index
    %0 = vector.load %arg2[%c0, %c0_0] : memref<8x128xf32, #tpu.memory_space<vmem>>, vector<8x128xf32>
    %c0_1 = arith.constant 0 : index
    %c0_2 = arith.constant 0 : index
    %c0_3 = arith.constant 0 : index
    %1 = vector.load %arg1[%c0_1, %c0_2, %c0_3] : memref<2x8x128xf32, #tpu.memory_space<vmem>>, vector<2x8x128xf32>
    %2 = vector.shape_cast %0 : vector<8x128xf32> to vector<1x8x128xf32>
    %3 = vector.broadcast %2 : vector<1x8x128xf32> to vector<2x8x128xf32>
    %4 = arith.addf %1, %3 : vector<2x8x128xf32>
    %c0_4 = arith.constant 0 : index
    %c0_5 = arith.constant 0 : index
    %c0_6 = arith.constant 0 : index
    %5 = vector.load %arg3[%c0_4, %c0_5, %c0_6] : memref<2x8x128xf32, #tpu.memory_space<vmem>>, vector<2x8x128xf32>
    tpu.vector_store %arg3[%c0_4, %c0_5, %c0_6], %4 {strides = array<i32>} : memref<2x8x128xf32, #tpu.memory_space<vmem>>, vector<2x8x128xf32>,
    return
  }
  func.func @transform_0(%arg0: i32) -> (i32, i32, i32) {
    %c0_i32 = arith.constant 0 : i32
    %c0_i32_0 = arith.constant 0 : i32
    %c0_i32_1 = arith.constant 0 : i32
    return %arg0, %c0_i32, %c0_i32_0 : i32, i32, i32
  }
  func.func @transform_1(%arg0: i32) -> (i32, i32) {
    %c0_i32 = arith.constant 0 : i32
    %c0_i32_0 = arith.constant 0 : i32
    %c0_i32_1 = arith.constant 0 : i32
    return %c0_i32, %c0_i32_0 : i32, i32
  }
  func.func @transform_2(%arg0: i32) -> (i32, i32, i32) {
    %c0_i32 = arith.constant 0 : i32
    %c0_i32_0 = arith.constant 0 : i32
    %c0_i32_1 = arith.constant 0 : i32
    return %arg0, %c0_i32, %c0_i32_0 : i32, i32, i32
  }
}

</mosaic_0001>

<bundles_post_ra>
// kernel: tpu_custom_call.1
= control target key start
LH: loop header
LB: loop body
LE: loop exit
PB: predicated region body
PF: predicated region fallthrough
CT: control target
= control target key end

     0   :  { %7 = vsyncpa [#allocation3], 0  ;;  %s205_s0 = inlined_call_operand.hbm [shape: f32[2,8,128], index: 0, kind: input, shape index: {}]   ;;  %s206_s1 = inlined_call_operand.hbm [shape: f32[16,128], index: 1, kind: input, shape index: {}]   ;;  %s207_s2 = inlined_call_operand.hbm [shape: f32[2,8,128], index: 2, kind: output, shape index: {}]  }
   0x1   :  { %8 = vsyncpa [#allocation6], 0 }
   0x2   :  { %9 = vsyncpa [#allocation4], 0  ;;  %s140_s9 = smov [#allocation2]   ;;  %s68_s13 = scalar_lea.hbm %s205_s0, 256 }
   0x3   :  { %s15_s10 = sshll.u32 %s140_s9, 4  ;;  %p69_p0 = scmp.ne.s32.totalorder %s205_s0, %s68_s13  ;;  %s16_s10 = int_to_ptr.vmem [resolvable:$true] %s15_s10 }
   0x4   :  { %p72_p1 = scmp.lt.u32.totalorder %s68_s13, %s205_s0 }
   0x6   :  { %p74_p2 = pnand %p72_p1, %p69_p0 }
   0x8   :  { %77 = shalt.err (!%p74_p2)
}
   0x9   :  { %s78_s18 = scalar_lea.vmem %s16_s10, 256  ;;  %p83_p4 = scmp.lt.s32.totalorder %s16_s10, %s16_s10 }
   0xa   :  { %p79_p3 = scmp.ne.s32.totalorder %s16_s10, %s78_s18  ;;  %p84_p5 = scmp.lt.s32.totalorder %s78_s18, %s78_s18 }
   0xc   :  { %p85_p6 = por %p84_p5, %p83_p4 }
   0xe   :  { %p86_p7 = pnand %p85_p6, %p79_p3 }
  0x10   :  { %89 = shalt.err (!%p86_p7)
}
  0x11   :  { %s141_s19 = smov 128   ;;  %s142_s20 = smov 8  }
  0x12   :  { %21 = dma.hbm_to_vmem [thread:$0]  %s205_s0, 256, %s16_s10, [#allocation3], %s141_s19, %s141_s19, %s142_s20  }
  0x13   :  { %s143_s23 = smov [#allocation5]   ;;  %s90_s27 = scalar_lea.hbm %s206_s1, 128 }
  0x14   :  { %s28_s24 = sshll.u32 %s143_s23, 4  ;;  %p91_p8 = scmp.ne.s32.totalorder %s206_s1, %s90_s27  ;;  %s29_s24 = int_to_ptr.vmem [resolvable:$true] %s28_s24 }
  0x15   :  { %s92_s4 = scalar_lea.hbm %s206_s1, 256  ;;  %p94_p10 = scmp.lt.u32.totalorder %s90_s27, %s206_s1 }
  0x16   :  { %p93_p9 = scmp.lt.u32.totalorder %s92_s4, %s90_s27 }
  0x18   :  { %p95_p11 = por %p94_p10, %p93_p9 }
  0x1a   :  { %p96_p12 = pnand %p95_p11, %p91_p8 }
  0x1c   :  { %99 = shalt.err (!%p96_p12)
}
  0x1d   :  { %s100_s0 = scalar_lea.vmem %s29_s24, 128  ;;  %p105_p0 = scmp.lt.s32.totalorder %s29_s24, %s29_s24 }
  0x1e   :  { %p101_p13 = scmp.ne.s32.totalorder %s29_s24, %s100_s0  ;;  %p106_p1 = scmp.lt.s32.totalorder %s100_s0, %s100_s0 }
  0x20   :  { %p107_p2 = por %p106_p1, %p105_p0 }
  0x22   :  { %p108_p3 = pnand %p107_p2, %p101_p13 }
  0x24   :  { %111 = shalt.err (!%p108_p3)
}
  0x25   :  { %31 = dma.hbm_to_vmem [thread:$0]  %s206_s1, 128, %s29_s24, [#allocation6]  }
  0x26   :  { %134 = dma.done.wait [#allocation3], 256  }
  0x27   :  { %135 = vsyncadd [#allocation3], 4294967040 }
  0x28   :  { %136 = dma.done.wait [#allocation6], 128  }
  0x29   :  { %137 = vsyncadd [#allocation6], 4294967168  ;;  %s144_s9 = smov [#allocation7]   ;;  %v38_v0 = vld [vmem:[#allocation5] sm:$0xff]  ;;  %v39_v1 = vld [vmem:[#allocation2] sm:$0xff] }
  0x2a   :  { %s50_s10 = sshll.u32 %s144_s9, 4  ;;  %v40_v2 = vld [vmem:[#allocation2 + $0x8] sm:$0xff]  ;;  %v41_v3 = vadd.f32 %v39_v1, %v38_v0  ;;  %s51_s10 = int_to_ptr.vmem [resolvable:$true] %s50_s10 }
  0x2b   :  { %v42_v4 = vadd.f32 %v40_v2, %v38_v0  ;;  %s112_s11 = scalar_lea.vmem %s51_s10, 256  ;;  %p117_p5 = scmp.lt.s32.totalorder %s51_s10, %s51_s10 }
  0x2c   :  { %43 = vst [vmem:[#allocation7] sm:$0xff] %v41_v3  ;;  %p113_p4 = scmp.ne.s32.totalorder %s51_s10, %s112_s11  ;;  %p118_p6 = scmp.lt.s32.totalorder %s112_s11, %s112_s11 }
  0x2d   :  { %44 = vst [vmem:[#allocation7 + $0x8] sm:$0xff] %v42_v4 }
  0x2e   :  { %p119_p7 = por %p118_p6, %p117_p5 }
  0x30   :  { %p120_p8 = pnand %p119_p7, %p113_p4 }
  0x32   :  { %123 = shalt.err (!%p120_p8)
}
  0x33   :  { %s124_s13 = scalar_lea.hbm %s207_s2, 256 }
  0x34   :  { %p125_p9 = scmp.ne.s32.totalorder %s207_s2, %s124_s13  ;;  %p128_p10 = scmp.lt.u32.totalorder %s124_s13, %s207_s2 }
  0x36   :  { %p130_p11 = pnand %p128_p10, %p125_p9 }
  0x38   :  { %133 = shalt.err (!%p130_p11)
}
  0x39   :  { %56 = dma.vmem_to_hbm [thread:$0]  %s51_s10, 256, %s207_s2, [#allocation4], %s141_s19, %s141_s19, %s142_s20  }
  0x3a   :  { %138 = dma.done.wait [#allocation4], 256  }
  0x3b   :  { %139 = vsyncadd [#allocation4], 4294967040 }
  0x3c   :  { %60 = vsyncpa [#allocation3], 1 }
  0x3d   :  { %61 = vsyncpa [#allocation6], 1 }
  0x3e   :  { %62 = vsyncpa [#allocation4], 1 }

</bundles_post_ra>
